<compile_context>
chip_gen: v7x
topology: tpu7x:2x2x1
jax: 0.10.0
libtpu: 0.0.40
codegen_flags: <defaults>
</compile_context>

<pallas_src>
import functools

import jax
import jax.numpy as jnp
from jax.experimental import pallas as pl
from jax.experimental.pallas import tpu as pltpu


def _simam_kernel(x_ref, o_ref, *, inv_hw, inv_n, e_lambda):
    # x_ref / o_ref: (Bt, Ct, HW).  HW is the full (possibly non-128-multiple)
    # spatial extent; Mosaic masks the lane tail for loads/reduces/stores.

    # Pass 1: spatial mean per (b, c).
    x = x_ref[...].astype(jnp.float32)
    mu = jnp.sum(x, axis=-1, keepdims=True) * inv_hw                # (Bt,Ct,1)

    # Pass 2: centered second moment.  Re-read the block from VMEM (cheap;
    # VMEM ld slots have slack in a HBM-bound kernel) instead of keeping the
    # pass-1 copy live, and avoid the sum(x^2) - mu*sum(x) cancellation.
    d = x_ref[...].astype(jnp.float32) - mu
    sum_d = jnp.sum(d * d, axis=-1, keepdims=True)                  # (Bt,Ct,1)
    inv_denom = 1.0 / (4.0 * (sum_d * inv_n + e_lambda))            # per (b,c)

    # Pass 3: elementwise gate and store (one more cheap VMEM re-read).
    xr = x_ref[...].astype(jnp.float32)
    dd = xr - mu
    y = dd * dd * inv_denom + 0.5
    o_ref[...] = (xr * jax.nn.sigmoid(y)).astype(o_ref.dtype)


def _pick_tiles(B, C, HW, itemsize):
    """Pick (Bt, Ct): blocks ~128 KiB - 1 MiB of f32 work (measured HBM
    roofline saturates around there), preferring >= 8 total grid steps so v7x
    gets >= ~4 iterations per TensorCore for prefetch overlap."""
    row_bytes = HW * 4                       # kernel math is f32
    target = 1 << 20                         # ~1 MiB block target
    min_block = 128 << 10                    # don't shrink below ~128 KiB

    # Channel tile must be a multiple of the sublane pack (8 f32 / 16 bf16)
    # or the full C (full-extent waiver).
    pack = 8 * max(1, 4 // max(itemsize, 1))
    c_divs = [d for d in range(1, C + 1) if C % d == 0]
    c_cands = [d for d in c_divs if d % pack == 0 or d == C]

    fitting = [d for d in c_cands if d * row_bytes <= target]
    Ct = max(fitting) if fitting else min(c_cands)

    # Fold batch elements only if a whole-C block is still under the target.
    Bt = 1
    if Ct == C:
        b_divs = [d for d in range(1, B + 1) if B % d == 0]
        fit_b = [d for d in b_divs if d * C * row_bytes <= target]
        Bt = max(fit_b) if fit_b else 1

    def steps(bt, ct):
        return (B // bt) * (C // ct)

    def block_bytes(bt, ct):
        return bt * ct * row_bytes

    # Prefer more grid steps without dropping below ~128 KiB blocks.
    while steps(Bt, Ct) < 8:
        if Bt > 1:
            nb = max(d for d in range(1, Bt) if B % d == 0)
            if block_bytes(nb, Ct) >= min_block:
                Bt = nb
                continue
        smaller = [d for d in c_cands if d < Ct and block_bytes(Bt, d) >= min_block]
        if smaller:
            Ct = max(smaller)
            continue
        break
    return Bt, Ct


def simam(x, e_lambda=1e-4):
    """x: (B, C, H, W). Returns (B, C, H, W), same dtype."""
    B, C, H, W = x.shape
    HW = H * W
    n = HW - 1
    # HW == 1 gives n == 0; the PyTorch module divides by zero there (NaN) —
    # mirror that behavior instead of silently changing semantics.
    inv_n = 1.0 / n if n > 0 else float("inf")

    itemsize = jnp.dtype(x.dtype).itemsize
    Bt, Ct = _pick_tiles(B, C, HW, itemsize)

    # VMEM budget: in + out blocks double-buffered, plus the f32 temporaries the
    # kernel materializes (~1 block-sized value live per pass) and slack for
    # Mosaic-internal scratch.  Capped against the physical per-core VMEM.
    hw_pad = ((HW + 127) // 128) * 128
    ct_pad = ((Ct + 7) // 8) * 8
    io_block = Bt * ct_pad * hw_pad * itemsize
    f32_block = Bt * ct_pad * hw_pad * 4
    need = 2 * 2 * io_block + 3 * f32_block + (4 << 20)
    try:
        vmem_cap = int(getattr(pltpu.get_tpu_info(), "vmem_capacity_bytes",
                               64 << 20))
    except Exception:
        vmem_cap = 64 << 20                  # v7x (smallest) as safe fallback
    vmem_limit = min(max(need, 16 << 20), int(vmem_cap * 0.9))

    # TODO(synk): for tiny spatial maps with huge channel counts (HW < 128,
    # C a multiple of 128), a (B, HW, C) layout with C on the lane axis would
    # give fully dense vst and no lane padding; needs a layout change upstream
    # of the kernel, so it is not done here.

    kernel = functools.partial(
        _simam_kernel,
        inv_hw=1.0 / float(HW),
        inv_n=float(inv_n),
        e_lambda=float(e_lambda),
    )

    x_flat = x.reshape(B, C, HW)             # pure reshape, no data movement
    out_flat = pl.pallas_call(
        kernel,
        out_shape=jax.ShapeDtypeStruct((B, C, HW), x.dtype),
        grid_spec=pltpu.PrefetchScalarGridSpec(
            num_scalar_prefetch=0,
            grid=(B // Bt, C // Ct),
            in_specs=[pl.BlockSpec((Bt, Ct, HW), lambda b, c: (b, c, 0))],
            out_specs=pl.BlockSpec((Bt, Ct, HW), lambda b, c: (b, c, 0)),
        ),
        compiler_params=pltpu.CompilerParams(
            dimension_semantics=("parallel", "parallel"),
            vmem_limit_bytes=int(vmem_limit),
        ),
    )(x_flat)
    return out_flat.reshape(B, C, H, W)


def simam_ref(x, e_lambda=1e-4):
    """Pure-JAX reference matching the PyTorch simam_module.forward."""
    B, C, H, W = x.shape
    n = W * H - 1
    mu = jnp.mean(x, axis=(2, 3), keepdims=True)
    d = (x - mu) ** 2
    y = d / (4.0 * (jnp.sum(d, axis=(2, 3), keepdims=True) / n + e_lambda)) + 0.5
    return x * jax.nn.sigmoid(y)


if __name__ == "__main__":
    e_lambda = 1e-4
    key = jax.random.PRNGKey(0)

    # Small shapes consistent with simam_module; the extra cases exercise the
    # ragged (non-128-multiple) HW path, tiny-C fallback, and a multi-step
    # (batch, channel) grid.
    shapes = [
        (2, 16, 16, 16),     # primary: HW=256 (lane-aligned)
        (2, 4, 14, 14),      # tiny C (full-C block), ragged HW=196
        (2, 128, 28, 28),    # multi-step grid on both axes, ragged HW=784
    ]
    for i, shp in enumerate(shapes):
        k = jax.random.fold_in(key, i)
        # Nonzero mean offset exercises the cancellation-safe centered stats.
        x = jax.random.normal(k, shp, dtype=jnp.float32) + 3.0
        out = simam(x, e_lambda=e_lambda)
        jax.block_until_ready(out)
        ref = simam_ref(x, e_lambda=e_lambda)
        assert out.shape == shp
        assert jnp.allclose(out, ref, atol=1e-4, rtol=1e-4), f"mismatch at {shp}"

    print("KERNEL_OK")
</pallas_src>

<mosaic_0001>
module attributes {stable_mosaic.version = 11 : i64} {
  func.func @_simam_kernel(%arg0: i32, %arg1: i32, %arg2: memref<2x16x256xf32, #tpu.memory_space<vmem>>, %arg3: memref<2x16x256xf32, #tpu.memory_space<vmem>>) attributes {dimension_semantics = [#tpu.dimension_semantics<parallel>, #tpu.dimension_semantics<parallel>], iteration_bounds = array<i64: 1, 1>, scalar_prefetch = 0 : i64, scratch_operands = 0 : i64, tpu.core_type = #tpu.core_type<tc>, window_params = [{transform_indices = @transform_0, window_bounds = array<i64: 2, 16, 256>}, {transform_indices = @transform_1, window_bounds = array<i64: 2, 16, 256>}]} {
    %c0 = arith.constant 0 : index
    %c0_0 = arith.constant 0 : index
    %c0_1 = arith.constant 0 : index
    %0 = vector.load %arg2[%c0, %c0_0, %c0_1] : memref<2x16x256xf32, #tpu.memory_space<vmem>>, vector<2x16x256xf32>
    %cst = arith.constant dense<0.000000e+00> : vector<2x16xf32>
    %1 = vector.multi_reduction <add>, %0, %cst [2] : vector<2x16x256xf32> to vector<2x16xf32>
    %2 = vector.shape_cast %1 : vector<2x16xf32> to vector<2x16x1xf32>
    %cst_2 = arith.constant 3.906250e-03 : f32
    %3 = vector.broadcast %cst_2 : f32 to vector<2x16x1xf32>
    %4 = arith.mulf %2, %3 : vector<2x16x1xf32>
    %c0_3 = arith.constant 0 : index
    %c0_4 = arith.constant 0 : index
    %c0_5 = arith.constant 0 : index
    %5 = vector.load %arg2[%c0_3, %c0_4, %c0_5] : memref<2x16x256xf32, #tpu.memory_space<vmem>>, vector<2x16x256xf32>
    %6 = vector.broadcast %4 : vector<2x16x1xf32> to vector<2x16x256xf32>
    %7 = arith.subf %5, %6 : vector<2x16x256xf32>
    %8 = arith.mulf %7, %7 : vector<2x16x256xf32>
    %cst_6 = arith.constant dense<0.000000e+00> : vector<2x16xf32>
    %9 = vector.multi_reduction <add>, %8, %cst_6 [2] : vector<2x16x256xf32> to vector<2x16xf32>
    %10 = vector.shape_cast %9 : vector<2x16xf32> to vector<2x16x1xf32>
    %cst_7 = arith.constant 0.00392156886 : f32
    %11 = vector.broadcast %cst_7 : f32 to vector<2x16x1xf32>
    %12 = arith.mulf %10, %11 : vector<2x16x1xf32>
    %cst_8 = arith.constant 9.99999974E-5 : f32
    %13 = vector.broadcast %cst_8 : f32 to vector<2x16x1xf32>
    %14 = arith.addf %12, %13 : vector<2x16x1xf32>
    %cst_9 = arith.constant 4.000000e+00 : f32
    %15 = vector.broadcast %cst_9 : f32 to vector<2x16x1xf32>
    %16 = arith.mulf %15, %14 : vector<2x16x1xf32>
    %cst_10 = arith.constant 1.000000e+00 : f32
    %17 = vector.broadcast %cst_10 : f32 to vector<2x16x1xf32>
    %18 = arith.divf %17, %16 : vector<2x16x1xf32>
    %c0_11 = arith.constant 0 : index
    %c0_12 = arith.constant 0 : index
    %c0_13 = arith.constant 0 : index
    %19 = vector.load %arg2[%c0_11, %c0_12, %c0_13] : memref<2x16x256xf32, #tpu.memory_space<vmem>>, vector<2x16x256xf32>
    %20 = vector.broadcast %4 : vector<2x16x1xf32> to vector<2x16x256xf32>
    %21 = arith.subf %19, %20 : vector<2x16x256xf32>
    %22 = arith.mulf %21, %21 : vector<2x16x256xf32>
    %23 = vector.broadcast %18 : vector<2x16x1xf32> to vector<2x16x256xf32>
    %24 = arith.mulf %22, %23 : vector<2x16x256xf32>
    %cst_14 = arith.constant 5.000000e-01 : f32
    %25 = vector.broadcast %cst_14 : f32 to vector<2x16x256xf32>
    %26 = arith.addf %24, %25 : vector<2x16x256xf32>
    %27 = arith.negf %26 : vector<2x16x256xf32>
    %28 = math.exp %27 : vector<2x16x256xf32>
    %cst_15 = arith.constant 1.000000e+00 : f32
    %29 = vector.broadcast %cst_15 : f32 to vector<2x16x256xf32>
    %30 = arith.addf %29, %28 : vector<2x16x256xf32>
    %31 = arith.divf %29, %30 : vector<2x16x256xf32>
    %32 = arith.mulf %19, %31 : vector<2x16x256xf32>
    %c0_16 = arith.constant 0 : index
    %c0_17 = arith.constant 0 : index
    %c0_18 = arith.constant 0 : index
    %33 = vector.load %arg3[%c0_16, %c0_17, %c0_18] : memref<2x16x256xf32, #tpu.memory_space<vmem>>, vector<2x16x256xf32>
    tpu.vector_store %arg3[%c0_16, %c0_17, %c0_18], %32 {strides = array<i32>} : memref<2x16x256xf32, #tpu.memory_space<vmem>>, vector<2x16x256xf32>,
    return
  }
  func.func @transform_0(%arg0: i32, %arg1: i32) -> (i32, i32, i32) {
    %c0_i32 = arith.constant 0 : i32
    %c0_i32_0 = arith.constant 0 : i32
    return %arg0, %arg1, %c0_i32 : i32, i32, i32
  }
  func.func @transform_1(%arg0: i32, %arg1: i32) -> (i32, i32, i32) {
    %c0_i32 = arith.constant 0 : i32
    %c0_i32_0 = arith.constant 0 : i32
    return %arg0, %arg1, %c0_i32 : i32, i32, i32
  }
}

</mosaic_0001>

<bundles_post_ra>
// kernel: tpu_custom_call.1
= control target key start
LH: loop header
LB: loop body
LE: loop exit
PB: predicated region body
PF: predicated region fallthrough
CT: control target
= control target key end

     0   :  { %6 = vsyncpa [#allocation3], 0  ;;  %s376_s0 = inlined_call_operand.hbm [shape: f32[2,16,256], index: 0, kind: input, shape index: {}]   ;;  %s377_s1 = inlined_call_operand.hbm [shape: f32[2,16,256], index: 1, kind: output, shape index: {}]  }
   0x1   :  { %7 = vsyncpa [#allocation4], 0  ;;  %s292_s6 = smov [#allocation2]   ;;  %s244_s10 = scalar_lea.hbm %s376_s0, 1024 }
   0x2   :  { %s13_s7 = sshll.u32 %s292_s6, 4  ;;  %p245_p0 = scmp.ne.s32.totalorder %s376_s0, %s244_s10  ;;  %s14_s7 = int_to_ptr.vmem [resolvable:$true] %s13_s7 }
   0x3   :  { %p248_p1 = scmp.lt.u32.totalorder %s244_s10, %s376_s0 }
   0x5   :  { %p250_p2 = pnand %p248_p1, %p245_p0 }
   0x7   :  { %253 = shalt.err (!%p250_p2)
}
   0x8   :  { %s254_s15 = scalar_lea.vmem %s14_s7, 1024  ;;  %p259_p4 = scmp.lt.s32.totalorder %s14_s7, %s14_s7 }
   0x9   :  { %p255_p3 = scmp.ne.s32.totalorder %s14_s7, %s254_s15  ;;  %p260_p5 = scmp.lt.s32.totalorder %s254_s15, %s254_s15 }
   0xb   :  { %p261_p6 = por %p260_p5, %p259_p4 }
   0xd   :  { %p262_p7 = pnand %p261_p6, %p255_p3 }
   0xf   :  { %265 = shalt.err (!%p262_p7)
}
  0x10   :  { %s293_s16 = smov 256   ;;  %s294_s17 = smov 16  }
  0x11   :  { %19 = dma.hbm_to_vmem [thread:$0]  %s376_s0, 1024, %s14_s7, [#allocation3], %s293_s16, %s293_s16, %s294_s17  }
  0x12   :  { %288 = dma.done.wait [#allocation3], 1024  }
  0x13   :  { %289 = vsyncadd [#allocation3], 4294966272  ;;  %v321_v0 = vld [vmem:[#allocation2] sm:$0xff]  ;;  %v323_v1 = vld [vmem:[#allocation2 + $0x8] sm:$0xff]  ;;  %s295_s0 = smov [#allocation5]  }
  0x14   :  { %v325_v2 = vld [vmem:[#allocation2 + $0x20] sm:$0xff]  ;;  %v31_v3 = vadd.f32 %v323_v1, %v321_v0  ;;  %v329_v4 = vld [vmem:[#allocation2 + $0x28] sm:$0xff]  ;;  %v331_v5 = vld [vmem:[#allocation2 + $0x10] sm:$0xff]  ;;  %s180_s20 = sshll.u32 %s295_s0, 4  ;;  %s181_s20 = int_to_ptr.vmem [resolvable:$true] %s180_s20 }
  0x15   :  { %v333_v6 = vld [vmem:[#allocation2 + $0x18] sm:$0xff]  ;;  %v37_v7 = vadd.f32 %v329_v4, %v325_v2  ;;  %v337_v8 = vld [vmem:[#allocation2 + $0x30] sm:$0xff]  ;;  %s266_s21 = scalar_lea.vmem %s181_s20, 1024  ;;  %p271_p9 = scmp.lt.s32.totalorder %s181_s20, %s181_s20 }
  0x16   :  { %v339_v9 = vld [vmem:[#allocation2 + $0x38] sm:$0xff]  ;;  %32 = vadd.xlane.f32.xlu0 %v31_v3  ;;  %v34_v10 = vadd.f32 %v333_v6, %v331_v5  ;;  %p267_p8 = scmp.ne.s32.totalorder %s181_s20, %s266_s21  ;;  %p272_p10 = scmp.lt.s32.totalorder %s266_s21, %s266_s21 }
  0x17   :  { %38 = vadd.xlane.f32.xlu1 %v37_v7  ;;  %v40_v11 = vadd.f32 %v339_v9, %v337_v8 }
  0x18   :  { %p273_p11 = por %p272_p10, %p271_p9 }
  0x1a   :  { %35 = vadd.xlane.f32.xlu0 %v34_v10  ;;  %p274_p12 = pnand %p273_p11, %p267_p8 }
  0x1b   :  { %41 = vadd.xlane.f32.xlu1 %v40_v11 }
  0xa3   :  { %v33_v12 = vpop.xlane.xlu0 %32 }
  0xa4   :  { %v43_v13 = vmul.f32 0.00390625, %v33_v12  ;;  %v39_v14 = vpop.xlane.xlu1 %38 }
  0xa5   :  { %v45_v15 = vmul.f32 0.00390625, %v39_v14 }
  0xa6   :  { %v47_v16 = vsub.f32 %v321_v0, %v43_v13  ;;  %v48_v17 = vsub.f32 %v323_v1, %v43_v13 }
  0xa7   :  { %v51_v18 = vsub.f32 %v325_v2, %v45_v15  ;;  %v52_v19 = vsub.f32 %v329_v4, %v45_v15  ;;  %v36_v20 = vpop.xlane.xlu0 %35 }
  0xa8   :  { %v55_v21 = vmul.f32 %v47_v16, %v47_v16  ;;  %v56_v22 = vmul.f32 %v48_v17, %v48_v17  ;;  %v44_v23 = vmul.f32 0.00390625, %v36_v20  ;;  %v42_v24 = vpop.xlane.xlu1 %41 }
  0xa9   :  { %v59_v25 = vmul.f32 %v51_v18, %v51_v18  ;;  %v60_v26 = vmul.f32 %v52_v19, %v52_v19  ;;  %v46_v27 = vmul.f32 0.00390625, %v42_v24 }
  0xaa   :  { %v49_v28 = vsub.f32 %v331_v5, %v44_v23  ;;  %v50_v29 = vsub.f32 %v333_v6, %v44_v23  ;;  %v63_v30 = vadd.f32 %v56_v22, %v55_v21 }
  0xab   :  { %v53_v31 = vsub.f32 %v337_v8, %v46_v27  ;;  %v54_v32 = vsub.f32 %v339_v9, %v46_v27  ;;  %v69_v35 = vadd.f32 %v60_v26, %v59_v25 }
  0xac   :  { %v57_v33 = vmul.f32 %v49_v28, %v49_v28  ;;  %v58_v34 = vmul.f32 %v50_v29, %v50_v29  ;;  %64 = vadd.xlane.f32.xlu0 %v63_v30 }
  0xad   :  { %v61_v36 = vmul.f32 %v53_v31, %v53_v31  ;;  %v62_v37 = vmul.f32 %v54_v32, %v54_v32 }
  0xae   :  { %v66_v38 = vadd.f32 %v58_v34, %v57_v33 }
  0xaf   :  { %v72_v39 = vadd.f32 %v62_v37, %v61_v36 }
  0xb0   :  { %70 = vadd.xlane.f32.xlu0 %v69_v35  ;;  %67 = vadd.xlane.f32.xlu1 %v66_v38 }
  0xb4   :  { %73 = vadd.xlane.f32.xlu1 %v72_v39 }
 0x139   :  { %v65_v40 = vpop.xlane.xlu0 %64 }
 0x13a   :  { %v75_v41 = vmul.f32 0.003921569, %v65_v40 }
 0x13c   :  { %v79_v42 = vadd.f32 0.0001, %v75_v41 }
 0x13d   :  { %v68_v43 = vpop.xlane.xlu1 %67  ;;  %v71_v44 = vpop.xlane.xlu0 %70 }
 0x13e   :  { %v83_v45 = vmul.f32 4.0, %v79_v42  ;;  %v76_v46 = vmul.f32 0.003921569, %v68_v43  ;;  %v77_v47 = vmul.f32 0.003921569, %v71_v44 }
 0x140   :  { %204 = vrcp.f32 %v83_v45  ;;  %v80_v48 = vadd.f32 0.0001, %v76_v46  ;;  %v81_v49 = vadd.f32 0.0001, %v77_v47 }
 0x141   :  { %v74_v50 = vpop.xlane.xlu1 %73 }
 0x142   :  { %v84_v51 = vmul.f32 4.0, %v80_v48  ;;  %v85_v52 = vmul.f32 4.0, %v81_v49  ;;  %v78_v53 = vmul.f32 0.003921569, %v74_v50 }
 0x144   :  { %206 = vrcp.f32 %v84_v51  ;;  %v82_v54 = vadd.f32 0.0001, %v78_v53 }
 0x145   :  { %208 = vrcp.f32 %v85_v52 }
 0x146   :  { %v86_v55 = vmul.f32 4.0, %v82_v54 }
 0x148   :  { %210 = vrcp.f32 %v86_v55 }
 0x14a   :  { %v205_v56 = vpop.eup %204 }
 0x14b   :  { %v95_v57 = vmul.f32 %v205_v56, %v55_v21  ;;  %v96_v58 = vmul.f32 %v205_v56, %v56_v22 }
 0x14d   :  { %v103_v59 = vadd.f32 0.5, %v95_v57  ;;  %v104_v60 = vadd.f32 0.5, %v96_v58 }
 0x14e   :  { %v207_v61 = vpop.eup %206 }
 0x14f   :  { %v209_v62 = vpop.eup %208  ;;  %v192_v63 = vmul.f32 -1.442695, %v103_v59  ;;  %v193_v3 = vmul.f32 -1.442695, %v104_v60  ;;  %v97_v7 = vmul.f32 %v207_v61, %v57_v33  ;;  %v98_v10 = vmul.f32 %v207_v61, %v58_v34 }
 0x150   :  { %v99_v11 = vmul.f32 %v209_v62, %v59_v25  ;;  %v100_v12 = vmul.f32 %v209_v62, %v60_v26 }
 0x151   :  { %212 = vpow2.f32 %v192_v63  ;;  %v105_v13 = vadd.f32 0.5, %v97_v7  ;;  %v106_v14 = vadd.f32 0.5, %v98_v10 }
 0x152   :  { %v211_v15 = vpop.eup %210  ;;  %214 = vpow2.f32 %v193_v3  ;;  %v107_v16 = vadd.f32 0.5, %v99_v11  ;;  %v108_v17 = vadd.f32 0.5, %v100_v12 }
 0x153   :  { %v194_v18 = vmul.f32 -1.442695, %v105_v13  ;;  %v195_v19 = vmul.f32 -1.442695, %v106_v14  ;;  %v101_v20 = vmul.f32 %v211_v15, %v61_v36  ;;  %v102_v21 = vmul.f32 %v211_v15, %v62_v37 }
 0x154   :  { %v196_v22 = vmul.f32 -1.442695, %v107_v16  ;;  %v197_v23 = vmul.f32 -1.442695, %v108_v17 }
 0x155   :  { %216 = vpow2.f32 %v194_v18  ;;  %v109_v24 = vadd.f32 0.5, %v101_v20  ;;  %v110_v27 = vadd.f32 0.5, %v102_v21 }
 0x156   :  { %218 = vpow2.f32 %v195_v19 }
 0x157   :  { %220 = vpow2.f32 %v196_v22  ;;  %v198_v25 = vmul.f32 -1.442695, %v109_v24  ;;  %v199_v26 = vmul.f32 -1.442695, %v110_v27 }
 0x158   :  { %222 = vpow2.f32 %v197_v23 }
 0x159   :  { %224 = vpow2.f32 %v198_v25 }
 0x15a   :  { %226 = vpow2.f32 %v199_v26 }
 0x15b   :  { %v213_v28 = vpop.eup %212 }
 0x15c   :  { %v215_v29 = vpop.eup %214  ;;  %v135_v30 = vadd.f32 1.0, %v213_v28 }
 0x15d   :  { %v136_v31 = vadd.f32 1.0, %v215_v29 }
 0x15e   :  { %228 = vrcp.f32 %v135_v30 }
 0x15f   :  { %v217_v32 = vpop.eup %216  ;;  %230 = vrcp.f32 %v136_v31 }
 0x160   :  { %v219_v33 = vpop.eup %218  ;;  %v137_v34 = vadd.f32 1.0, %v217_v32 }
 0x161   :  { %v221_v35 = vpop.eup %220  ;;  %v138_v36 = vadd.f32 1.0, %v219_v33 }
 0x162   :  { %v223_v37 = vpop.eup %222  ;;  %232 = vrcp.f32 %v137_v34  ;;  %v139_v38 = vadd.f32 1.0, %v221_v35 }
 0x163   :  { %v225_v39 = vpop.eup %224  ;;  %234 = vrcp.f32 %v138_v36  ;;  %v140_v40 = vadd.f32 1.0, %v223_v37 }
 0x164   :  { %v227_v41 = vpop.eup %226  ;;  %236 = vrcp.f32 %v139_v38  ;;  %v141_v42 = vadd.f32 1.0, %v225_v39 }
 0x165   :  { %238 = vrcp.f32 %v140_v40  ;;  %v142_v43 = vadd.f32 1.0, %v227_v41 }
 0x166   :  { %240 = vrcp.f32 %v141_v42 }
 0x167   :  { %242 = vrcp.f32 %v142_v43 }
 0x168   :  { %v229_v44 = vpop.eup %228 }
 0x169   :  { %v231_v45 = vpop.eup %230  ;;  %v159_v46 = vmul.f32 %v229_v44, %v321_v0 }
 0x16a   :  { %v160_v47 = vmul.f32 %v231_v45, %v323_v1 }
 0x16b   :  { %167 = vst [vmem:[#allocation5] sm:$0xff] %v159_v46 }
 0x16c   :  { %v233_v48 = vpop.eup %232  ;;  %168 = vst [vmem:[#allocation5 + $0x8] sm:$0xff] %v160_v47 }
 0x16d   :  { %v235_v49 = vpop.eup %234  ;;  %v161_v50 = vmul.f32 %v233_v48, %v331_v5 }
 0x16e   :  { %v237_v51 = vpop.eup %236  ;;  %v162_v52 = vmul.f32 %v235_v49, %v333_v6 }
 0x16f   :  { %v239_v53 = vpop.eup %238  ;;  %v163_v54 = vmul.f32 %v237_v51, %v325_v2  ;;  %169 = vst [vmem:[#allocation5 + $0x10] sm:$0xff] %v161_v50 }
 0x170   :  { %v241_v55 = vpop.eup %240  ;;  %v164_v0 = vmul.f32 %v239_v53, %v329_v4  ;;  %170 = vst [vmem:[#allocation5 + $0x18] sm:$0xff] %v162_v52 }
 0x171   :  { %v243_v1 = vpop.eup %242  ;;  %v165_v56 = vmul.f32 %v241_v55, %v337_v8  ;;  %171 = vst [vmem:[#allocation5 + $0x20] sm:$0xff] %v163_v54 }
 0x172   :  { %v166_v57 = vmul.f32 %v243_v1, %v339_v9  ;;  %172 = vst [vmem:[#allocation5 + $0x28] sm:$0xff] %v164_v0 }
 0x173   :  { %173 = vst [vmem:[#allocation5 + $0x30] sm:$0xff] %v165_v56 }
 0x174   :  { %174 = vst [vmem:[#allocation5 + $0x38] sm:$0xff] %v166_v57 }
 0x175   :  { %277 = shalt.err (!%p274_p12)
}
 0x176   :  { %s278_s24 = scalar_lea.hbm %s377_s1, 1024 }
 0x177   :  { %p279_p13 = scmp.ne.s32.totalorder %s377_s1, %s278_s24  ;;  %p282_p0 = scmp.lt.u32.totalorder %s278_s24, %s377_s1 }
 0x179   :  { %p284_p1 = pnand %p282_p0, %p279_p13 }
 0x17b   :  { %287 = shalt.err (!%p284_p1)
}
 0x17c   :  { %186 = dma.vmem_to_hbm [thread:$0]  %s181_s20, 1024, %s377_s1, [#allocation4], %s293_s16, %s293_s16, %s294_s17  }
 0x17d   :  { %290 = dma.done.wait [#allocation4], 1024  }
 0x17e   :  { %291 = vsyncadd [#allocation4], 4294966272 }
 0x17f   :  { %190 = vsyncpa [#allocation3], 1 }
 0x180   :  { %191 = vsyncpa [#allocation4], 1 }

</bundles_post_ra>
